<compile_context>
chip_gen: v7x
topology: tpu7x:2x2x1
jax: 0.10.0
libtpu: 0.0.40
codegen_flags: <defaults>
</compile_context>

<pallas_src>
import functools

import jax
import jax.numpy as jnp
from jax import lax
from jax.experimental import pallas as pl
from jax.experimental.pallas import tpu as pltpu


def _round_up(x, m):
    return (x + m - 1) // m * m


def _mmd_kernel(x_ref, w_ref, o_ref, g_acc, *, sigma_list):
    """Grid axis 0 iterates feature chunks; Gram matrix accumulates in VMEM."""
    k = pl.program_id(0)

    @pl.when(k == 0)
    def _():
        g_acc[...] = jnp.zeros_like(g_acc)

    # Gram update on the MXU: contract the feature dim of both operands
    # directly (X . X^T) -- no explicit transpose, native operand dtype,
    # f32 accumulation.
    xt = x_ref[...]                                    # (r_pad, tk)
    g_acc[...] += lax.dot_general(
        xt, xt,
        dimension_numbers=(((1,), (1,)), ((), ())),
        preferred_element_type=jnp.float32)

    @pl.when(k == pl.num_programs(0) - 1)
    def _():
        g = g_acc[...]                                 # (r_pad, r_pad) f32
        r = g.shape[0]

        # Row squared-norms from the Gram diagonal (iota mask; symmetric, so
        # axis=1 / axis=0 reductions give column / row forms w/o transpose).
        row_i = lax.broadcasted_iota(jnp.int32, (r, r), 0)
        col_i = lax.broadcasted_iota(jnp.int32, (r, r), 1)
        g_diag = jnp.where(row_i == col_i, g, 0.0)
        sq_col = jnp.sum(g_diag, axis=1, keepdims=True)    # (r, 1)
        sq_row = jnp.sum(g_diag, axis=0, keepdims=True)    # (1, r)

        # Pairwise squared distances, clamped against tiny negative roundoff.
        d = jnp.maximum(sq_col + sq_row - 2.0 * g, 0.0)

        # Streamed mixed-RBF reduction: scalar accumulator, one exp per sigma,
        # weights already carry the +1/m^2, +1/n^2, -2/(m n) factors.
        w = w_ref[...]                                 # (r_pad, r_pad) f32
        acc = jnp.float32(0.0)
        for sigma in sigma_list:                       # static unroll -> EUP exp
            gamma = 1.0 / (2.0 * sigma * sigma)
            acc = acc + jnp.sum(w * jnp.exp(-gamma * d))

        # F.relu followed by sqrt.
        # TODO(synk): sqrt has an infinite gradient at 0+; forward-only here.
        o_ref[0, 0] = jnp.sqrt(jnp.maximum(acc, 0.0))


def mmd_loss(target, source, base=1.0, sigma_list=(1.0, 2.0, 10.0)):
    """Pallas implementation of MMDLoss.forward.

    target: (m, C, 1, 1) or (m, C); source: (n, C, 1, 1) or (n, C).
    Returns a scalar f32 = sqrt(relu(biased mix-RBF MMD^2)).
    """
    sigmas = tuple(float(s) / float(base) for s in sigma_list)

    # Flatten exactly like Target.view(Target.size(0), -1).
    t2 = target.reshape(target.shape[0], -1)
    s2 = source.reshape(source.shape[0], -1)
    m, c = t2.shape
    n, c2 = s2.shape
    assert c == c2, "Target/Source feature dims must match"

    # Keep bf16/f32 operands native for the MXU; only promote non-floats.
    if not jnp.issubdtype(t2.dtype, jnp.floating):
        t2 = t2.astype(jnp.float32)
    if not jnp.issubdtype(s2.dtype, jnp.floating):
        s2 = s2.astype(jnp.float32)
    dtype = jnp.promote_types(t2.dtype, s2.dtype)
    x = jnp.concatenate([t2.astype(dtype), s2.astype(dtype)], axis=0)  # (m+n, C)

    # Pad rows to a sublane multiple and features to the chunk size; zero
    # rows/cols are neutral (zero Gram contribution + zero weights).
    r = m + n
    r_pad = _round_up(r, 8)
    tk = min(1024, _round_up(c, 128))       # feature chunk (lane-aligned)
    c_pad = _round_up(c, tk)
    x = jnp.pad(x, ((0, r_pad - r), (0, c_pad - c)))

    # Signed quadratic-form weights: mmd2 = w^T K w with
    #   w = [+1/m]*m ++ [-1/n]*n ++ [0]*pad  (biased estimate, valid m != n).
    row = jnp.arange(r_pad)
    w_vec = jnp.where(row < m, 1.0 / m,
                      jnp.where(row < r, -1.0 / n, 0.0)).astype(jnp.float32)
    w_mat = w_vec[:, None] * w_vec[None, :]            # (r_pad, r_pad)

    kernel = functools.partial(_mmd_kernel, sigma_list=sigmas)

    out = pl.pallas_call(
        kernel,
        out_shape=jax.ShapeDtypeStruct((1, 1), jnp.float32),
        grid_spec=pltpu.PrefetchScalarGridSpec(
            num_scalar_prefetch=0,
            grid=(c_pad // tk,),
            in_specs=[
                pl.BlockSpec((r_pad, tk), lambda k: (0, k)),        # X chunk
                pl.BlockSpec((r_pad, r_pad), lambda k: (0, 0)),     # weights
            ],
            out_specs=pl.BlockSpec(
                (1, 1), lambda k: (0, 0),
                memory_space=pltpu.MemorySpace.SMEM),
            scratch_shapes=[pltpu.VMEM((r_pad, r_pad), jnp.float32)],
        ),
        compiler_params=pltpu.CompilerParams(
            dimension_semantics=("arbitrary",),        # feature reduction axis
        ),
    )(x, w_mat)
    return out[0, 0]


def _mmd_loss_ref(target, source, base=1.0, sigma_list=(1.0, 2.0, 10.0)):
    """Pure-JAX reference (biased mix-RBF MMD^2 -> relu -> sqrt)."""
    t = target.reshape(target.shape[0], -1).astype(jnp.float32)
    s = source.reshape(source.shape[0], -1).astype(jnp.float32)
    m, n = t.shape[0], s.shape[0]
    x = jnp.concatenate([t, s], axis=0)
    g = x @ x.T
    sq = jnp.diag(g)
    d = jnp.maximum(sq[:, None] + sq[None, :] - 2.0 * g, 0.0)
    k = sum(jnp.exp(-d / (2.0 * (sig / base) ** 2)) for sig in sigma_list)
    mmd2 = (jnp.sum(k[:m, :m]) / (m * m)
            + jnp.sum(k[m:, m:]) / (n * n)
            - 2.0 * jnp.sum(k[:m, m:]) / (m * n))
    return jnp.sqrt(jnp.maximum(mmd2, 0.0))


if __name__ == "__main__":
    # Small deterministic inputs consistent with "batch x 2048 x 1 x 1".
    B, C = 8, 2048
    key = jax.random.PRNGKey(0)
    k_t, k_s = jax.random.split(key)
    target = jax.random.normal(k_t, (B, C, 1, 1), dtype=jnp.float32)
    source = 0.5 * jax.random.normal(k_s, (B, C, 1, 1), dtype=jnp.float32) + 0.1

    loss = mmd_loss(target, source)
    jax.block_until_ready(loss)

    ref = _mmd_loss_ref(target, source)
    assert abs(float(loss) - float(ref)) < 1e-3, (float(loss), float(ref))
    print("KERNEL_OK")
</pallas_src>

<mosaic_0001>
module attributes {stable_mosaic.version = 11 : i64} {
  func.func @_mmd_kernel(%arg0: i32, %arg1: memref<16x1024xf32, #tpu.memory_space<vmem>>, %arg2: memref<16x16xf32, #tpu.memory_space<vmem>>, %arg3: memref<1x1xf32, #tpu.memory_space<smem>>, %arg4: memref<16x16xf32, #tpu.memory_space<vmem>>) attributes {dimension_semantics = [#tpu.dimension_semantics<arbitrary>], iteration_bounds = array<i64: 2>, scalar_prefetch = 0 : i64, scratch_operands = 1 : i64, tpu.core_type = #tpu.core_type<tc>, window_params = [{transform_indices = @transform_0, window_bounds = array<i64: 16, 1024>}, {pipeline_mode = #tpu.pipeline_mode<synchronous>, transform_indices = @transform_1, window_bounds = array<i64: 16, 16>}, {transform_indices = @transform_2, window_bounds = array<i64: 1, 1>}]} {
    %c0_i32 = arith.constant 0 : i32
    %0 = arith.cmpi eq, %arg0, %c0_i32 : i32
    %1 = arith.extui %0 : i1 to i32
    %c0_i32_0 = arith.constant 0 : i32
    %2 = arith.cmpi ne, %1, %c0_i32_0 : i32
    scf.if %2 {
      %cst_7 = arith.constant 0.000000e+00 : f32
      %11 = vector.broadcast %cst_7 : f32 to vector<16x16xf32>
      %c0_8 = arith.constant 0 : index
      %c0_9 = arith.constant 0 : index
      %12 = vector.load %arg4[%c0_8, %c0_9] : memref<16x16xf32, #tpu.memory_space<vmem>>, vector<16x16xf32>
      tpu.vector_store %arg4[%c0_8, %c0_9], %11 {strides = array<i32>} : memref<16x16xf32, #tpu.memory_space<vmem>>, vector<16x16xf32>,
    } else {
    }
    %c0 = arith.constant 0 : index
    %c0_1 = arith.constant 0 : index
    %3 = vector.load %arg1[%c0, %c0_1] : memref<16x1024xf32, #tpu.memory_space<vmem>>, vector<16x1024xf32>
    %c0_2 = arith.constant 0 : index
    %c0_3 = arith.constant 0 : index
    %4 = vector.load %arg4[%c0_2, %c0_3] : memref<16x16xf32, #tpu.memory_space<vmem>>, vector<16x16xf32>
    %cst = arith.constant dense<0.000000e+00> : vector<16x16xf32>
    %5 = tpu.matmul %3, %3, %cst {dimension_numbers = #tpu.dot_dimension_numbers<[1], [1], [0], [0], [0, 0, 1, 0], [], []>} : vector<16x1024xf32>, vector<16x1024xf32>, vector<16x16xf32> -> vector<16x16xf32>
    %6 = arith.addf %4, %5 : vector<16x16xf32>
    %c0_4 = arith.constant 0 : index
    %c0_5 = arith.constant 0 : index
    %7 = vector.load %arg4[%c0_4, %c0_5] : memref<16x16xf32, #tpu.memory_space<vmem>>, vector<16x16xf32>
    tpu.vector_store %arg4[%c0_4, %c0_5], %6 {strides = array<i32>} : memref<16x16xf32, #tpu.memory_space<vmem>>, vector<16x16xf32>,
    %c1_i32 = arith.constant 1 : i32
    %8 = arith.cmpi eq, %arg0, %c1_i32 : i32
    %9 = arith.extui %8 : i1 to i32
    %c0_i32_6 = arith.constant 0 : i32
    %10 = arith.cmpi ne, %9, %c0_i32_6 : i32
    scf.if %10 {
      %c0_7 = arith.constant 0 : index
      %c0_8 = arith.constant 0 : index
      %11 = vector.load %arg4[%c0_7, %c0_8] : memref<16x16xf32, #tpu.memory_space<vmem>>, vector<16x16xf32>
      %12 = tpu.iota {dimensions = array<i32: 0>} : vector<16x16xi32>
      %13 = tpu.iota {dimensions = array<i32: 1>} : vector<16x16xi32>
      %14 = arith.cmpi eq, %12, %13 : vector<16x16xi32>
      %cst_9 = arith.constant 0.000000e+00 : f32
      %15 = vector.broadcast %cst_9 : f32 to vector<16x16xf32>
      %16 = arith.select %14, %11, %15 : vector<16x16xi1>, vector<16x16xf32>
      %cst_10 = arith.constant dense<0.000000e+00> : vector<16xf32>
      %17 = vector.multi_reduction <add>, %16, %cst_10 [1] : vector<16x16xf32> to vector<16xf32>
      %18 = vector.shape_cast %17 : vector<16xf32> to vector<16x1xf32>
      %cst_11 = arith.constant dense<0.000000e+00> : vector<16xf32>
      %19 = vector.multi_reduction <add>, %16, %cst_11 [0] : vector<16x16xf32> to vector<16xf32>
      %20 = vector.shape_cast %19 : vector<16xf32> to vector<1x16xf32>
      %21 = vector.broadcast %18 : vector<16x1xf32> to vector<16x16xf32>
      %22 = vector.broadcast %20 : vector<1x16xf32> to vector<16x16xf32>
      %23 = arith.addf %21, %22 : vector<16x16xf32>
      %cst_12 = arith.constant 2.000000e+00 : f32
      %24 = vector.broadcast %cst_12 : f32 to vector<16x16xf32>
      %25 = arith.mulf %24, %11 : vector<16x16xf32>
      %26 = arith.subf %23, %25 : vector<16x16xf32>
      %cst_13 = arith.constant 0.000000e+00 : f32
      %27 = vector.broadcast %cst_13 : f32 to vector<16x16xf32>
      %28 = arith.maximumf %26, %27 : vector<16x16xf32>
      %c0_14 = arith.constant 0 : index
      %c0_15 = arith.constant 0 : index
      %29 = vector.load %arg2[%c0_14, %c0_15] : memref<16x16xf32, #tpu.memory_space<vmem>>, vector<16x16xf32>
      %cst_16 = arith.constant -5.000000e-01 : f32
      %30 = vector.broadcast %cst_16 : f32 to vector<16x16xf32>
      %31 = arith.mulf %30, %28 : vector<16x16xf32>
      %32 = math.exp %31 : vector<16x16xf32>
      %33 = arith.mulf %29, %32 : vector<16x16xf32>
      %34 = vector.shape_cast %33 : vector<16x16xf32> to vector<1x16x16xf32>
      %cst_17 = arith.constant dense<0.000000e+00> : vector<1xf32>
      %35 = vector.multi_reduction <add>, %34, %cst_17 [1, 2] : vector<1x16x16xf32> to vector<1xf32>
      %36 = vector.shape_cast %35 : vector<1xf32> to vector<1x1x1xf32>
      %37 = vector.extract %36[0, 0, 0] : f32 from vector<1x1x1xf32>
      %cst_18 = arith.constant 0.000000e+00 : f32
      %38 = arith.addf %cst_18, %37 : f32
      %cst_19 = arith.constant -1.250000e-01 : f32
      %39 = vector.broadcast %cst_19 : f32 to vector<16x16xf32>
      %40 = arith.mulf %39, %28 : vector<16x16xf32>
      %41 = math.exp %40 : vector<16x16xf32>
      %42 = arith.mulf %29, %41 : vector<16x16xf32>
      %43 = vector.shape_cast %42 : vector<16x16xf32> to vector<1x16x16xf32>
      %cst_20 = arith.constant dense<0.000000e+00> : vector<1xf32>
      %44 = vector.multi_reduction <add>, %43, %cst_20 [1, 2] : vector<1x16x16xf32> to vector<1xf32>
      %45 = vector.shape_cast %44 : vector<1xf32> to vector<1x1x1xf32>
      %46 = vector.extract %45[0, 0, 0] : f32 from vector<1x1x1xf32>
      %47 = arith.addf %38, %46 : f32
      %cst_21 = arith.constant -5.000000e-03 : f32
      %48 = vector.broadcast %cst_21 : f32 to vector<16x16xf32>
      %49 = arith.mulf %48, %28 : vector<16x16xf32>
      %50 = math.exp %49 : vector<16x16xf32>
      %51 = arith.mulf %29, %50 : vector<16x16xf32>
      %52 = vector.shape_cast %51 : vector<16x16xf32> to vector<1x16x16xf32>
      %cst_22 = arith.constant dense<0.000000e+00> : vector<1xf32>
      %53 = vector.multi_reduction <add>, %52, %cst_22 [1, 2] : vector<1x16x16xf32> to vector<1xf32>
      %54 = vector.shape_cast %53 : vector<1xf32> to vector<1x1x1xf32>
      %55 = vector.extract %54[0, 0, 0] : f32 from vector<1x1x1xf32>
      %56 = arith.addf %47, %55 : f32
      %cst_23 = arith.constant 0.000000e+00 : f32
      %57 = arith.maximumf %56, %cst_23 : f32
      %58 = math.sqrt %57 : f32
      %c0_24 = arith.constant 0 : index
      %c0_25 = arith.constant 0 : index
      %59 = memref.load %arg3[%c0_24, %c0_25] : memref<1x1xf32, #tpu.memory_space<smem>>
      memref.store %58, %arg3[%c0_24, %c0_25] : memref<1x1xf32, #tpu.memory_space<smem>>
    } else {
    }
    return
  }
  func.func @transform_0(%arg0: i32) -> (i32, i32) {
    %c0_i32 = arith.constant 0 : i32
    %c0_i32_0 = arith.constant 0 : i32
    return %c0_i32, %arg0 : i32, i32
  }
  func.func @transform_1(%arg0: i32) -> (i32, i32) {
    %c0_i32 = arith.constant 0 : i32
    %c0_i32_0 = arith.constant 0 : i32
    %c0_i32_1 = arith.constant 0 : i32
    return %c0_i32, %c0_i32_0 : i32, i32
  }
  func.func @transform_2(%arg0: i32) -> (i32, i32) {
    %c0_i32 = arith.constant 0 : i32
    %c0_i32_0 = arith.constant 0 : i32
    %c0_i32_1 = arith.constant 0 : i32
    return %c0_i32, %c0_i32_0 : i32, i32
  }
}

</mosaic_0001>

<bundles_post_ra>
// kernel: tpu_custom_call.1
= control target key start
LH: loop header
LB: loop body
LE: loop exit
PB: predicated region body
PF: predicated region fallthrough
CT: control target
= control target key end

     0   :  { %7 = vsyncpa [#allocation4], 0  ;;  %s1121_s0 = inlined_call_operand.hbm [shape: f32[16,2048], index: 0, kind: input, shape index: {}]   ;;  %s1122_s1 = inlined_call_operand.hbm [shape: f32[16,16], index: 1, kind: input, shape index: {}]   ;;  %s1123_s2 = inlined_call_operand.hbm [shape: f32[1,1], index: 2, kind: output, shape index: {}]  }
   0x1   :  { %9 = vsyncpa [#allocation4 + $0x1], 0 }
   0x2   :  { %10 = vsyncpa [#allocation7], 0 }
   0x3   :  { %11 = vsyncpa [#allocation5], 0  ;;  %s933_s9 = smov 0   ;;  %s935_s10 = smov 0  }
   0x4   :  { %s937_s11 = smov 0   ;;  %s939_s12 = smov 0  }
   0x5 LB: > { %s952_s13 = sadd.s32 4294967295, %s906_s12   ;;  %s955_s14 = sadd.s32 1, %s906_s12   ;;  %s906_s12 = sphi %s939_s12, %s1142_s12   ;;  %s902_s11 = sphi %s937_s11, %s1141_s11   ;;  %s898_s10 = sphi %s935_s10, %s1140_s10   ;;  %s894_s9 = sphi %s933_s9, %s1139_s9  }
   0x6   : > { %s21_s15 = ssub.s32 %s906_s12, %s955_s14  ;;  %s24_s16 = sadd.s32 1, %s902_s11 }
   0x7   : > { %p22_p0 = scmp.eq.s32.totalorder %s21_s15, 0  ;;  %p31_p1 = scmp.ne.s32.totalorder %s902_s11, %s898_s10 }
   0x8   : > { %p32_p2 = scmp.eq.s32.totalorder %s906_s12, 0  ;;  %p37_p3 = scmp.ne.s32.totalorder %s898_s10, %s894_s9 }
   0x9   : > { %s965_s17 = scalar_select %p22_p0, %s902_s11, %s24_s16  }
   0xa   : > { %p967_p4 = por %p32_p2, %p31_p1  ;;  %p1124_p5 = scmp.eq.s32.totalorder %s952_s13, 0 }
   0xb   : > { %p676_p6 = scmp.ge.s32.totalorder %s906_s12, 1  ;;  %p90_p7 = scmp.lt.s32.totalorder %s906_s12, 3 }
   0xc   : > { %p976_p8 = por %p1124_p5, %p37_p3  ;;  %s908_s21 = smov [#allocation6]  }
   0xd   : > { %p981_p10 = pnand %p676_p6, %p90_p7  ;;  %s102_s22 = sshll.u32 %s908_s21, 4  ;;  %s103_s22 = int_to_ptr.vmem [resolvable:$true] %s102_s22 }
   0xe   : > { %s1129_s19 = scalar_select %p976_p8, 1, 0 }
   0xf   : > { %s1130_s20 = scalar_select %p981_p10, 1, 0 }
  0x10   : > { %p726_p11 = pneg %p981_p10  ;;  %p735_p13 = scmp.lt.s32.totalorder %s906_s12, 2 }
  0x11   : > { %s116_s24 = sand.u32 1, %s902_s11   ;;  %s691_s25 = sshll.u32 %s906_s12, 10 }
  0x12   : > { %p989_p12 = pnand %p726_p11, %p1124_p5  ;;  %p998_p0 = pnand %p735_p13, %p967_p4 }
  0x13   : > { %s794_s29 = scalar_lea.hbm %s1122_s1, 256 }
  0x14   : > { %s1132_s26 = scalar_select %p998_p0, 1, 0 }
  0x15   : > { %p795_p1 = scmp.ne.s32.totalorder %s1122_s1, %s794_s29  ;;  %p796_p2 = pneg %p989_p12 }
  0x16   : > { %p801_p7 = scmp.lt.u32.totalorder %s794_s29, %s1122_s1 }
  0x17   : > { %p797_p3 = pnand %p796_p2, %p795_p1 }
  0x19   : > { %p798_p6 = pneg %p797_p3 }
  0x1b   : > { %p803_p4 = pnand %p801_p7, %p798_p6 }
  0x1d   : > { %806 = shalt.err (!%p803_p4)
}
  0x1e   : > { %s807_s6 = scalar_lea.vmem %s103_s22, 256  ;;  %p815_p5 = scmp.lt.s32.totalorder %s103_s22, %s103_s22 }
  0x1f   : > { %p808_p11 = scmp.ne.s32.totalorder %s103_s22, %s807_s6  ;;  %p816_p8 = scmp.lt.s32.totalorder %s807_s6, %s807_s6 }
  0x21   : > { %p810_p13 = pnand %p808_p11, %p796_p2  ;;  %p817_p10 = por %p816_p8, %p815_p5 }
  0x23   : > { %p811_p9 = pneg %p810_p13 }
  0x25   : > { %p818_p0 = pnand %p817_p10, %p811_p9 }
  0x27   : > { %821 = shalt.err (!%p818_p0)
}
  0x28   : > { %s909_s7 = smov 128   ;;  %s910_s8 = smov 8  }
  0x29   : > { %729 = dma.hbm_to_vmem [thread:$0]  (!%p989_p12), %s1122_s1, 256, %s103_s22, [#allocation7], %s909_s7, %s909_s7, %s910_s8  }
  0x2a   : > { %s679_s15 = sshll.u32 %s116_s24, 7  ;;  %s1021_s21 = scalar_lea.hbm %s1121_s0, %s691_s25 }
  0x2b   : > { %s120_s27 = scalar_lea.vmem [#allocation3], %s679_s15  ;;  %s1025_s29 = scalar_lea.sflag [#allocation4], %s116_s24 }
  0x2c   : > { %s127_s28 = sshll.u32 %s120_s27, 4  ;;  %s822_s23 = scalar_lea.hbm %s1021_s21, 2048  ;;  %s1023_s28 = int_to_ptr.vmem [resolvable:$true] %s127_s28 }
  0x2d   : > { %p823_p5 = scmp.ne.s32.totalorder %s1021_s21, %s822_s23  ;;  %p1133_p8 = scmp.ne.s32.totalorder %s1132_s26, 0 }
  0x2e   : > { %s827_s30 = scalar_lea.hbm %s1121_s0, 4096  ;;  %p828_p0 = scmp.lt.u32.totalorder %s1021_s21, %s1121_s0 }
  0x2f   : > { %p824_p9 = pneg %p1133_p8  ;;  %p829_p1 = scmp.lt.u32.totalorder %s827_s30, %s822_s23 }
  0x30   : > { %p831_p3 = scmp.lt.u32.totalorder %s822_s23, %s1021_s21 }
  0x31   : > { %p825_p10 = pnand %p824_p9, %p823_p5  ;;  %p830_p2 = por %p829_p1, %p828_p0 }
  0x33   : > { %p826_p12 = pneg %p825_p10  ;;  %p832_p6 = por %p831_p3, %p830_p2 }
  0x35   : > { %p833_p7 = pnand %p832_p6, %p826_p12 }
  0x37   : > { %836 = shalt.err (!%p833_p7)
}
  0x38   : > { %s837_s24 = scalar_lea.vmem %s1023_s28, 2048  ;;  %s911_s5 = smov [#allocation3]  }
  0x39   : > { %p838_p4 = scmp.ne.s32.totalorder %s1023_s28, %s837_s24  ;;  %s842_s6 = sshll.u32 %s911_s5, 4  ;;  %s843_s6 = int_to_ptr.vmem [resolvable:$false] %s842_s6 }
  0x3a   : > { %s844_s7 = scalar_lea.vmem %s843_s6, 4096  ;;  %p845_p5 = scmp.lt.s32.totalorder %s1023_s28, %s843_s6 }
  0x3b   : > { %p840_p11 = pnand %p838_p4, %p824_p9  ;;  %p846_p10 = scmp.lt.s32.totalorder %s844_s7, %s837_s24 }
  0x3d   : > { %p841_p13 = pneg %p840_p11  ;;  %p847_p0 = por %p846_p10, %p845_p5 }
  0x3f   : > { %p848_p1 = pnand %p847_p0, %p841_p13 }
  0x41   : > { %851 = shalt.err (!%p848_p1)
}
  0x42   : > { %s912_s8 = smov 2048   ;;  %s913_s9 = smov 1024  }
  0x43   : > { %s914_s12 = smov 64   ;;  %p1134_p9 = scmp.ne.s32.totalorder %s1130_s20, 0 }
  0x44   : > { %733 = dma.hbm_to_vmem [thread:$0]  (!%p1133_p8), %s1021_s21, 2048, %s1023_s28, %s1025_s29, %s912_s8, %s913_s9, %s914_s12  }
  0x45   : > { %139 = sbr.rel (%p1134_p9) target bundleno = 805 (0x325), region = 28  ;;  %s141_s15 = sand.u32 (!%p1134_p9), 1, %s898_s10  }
  0x46   : > { %s683_s16 = sshll.u32 (!%p1134_p9), %s141_s15, 7  ;;  %s142_s18 = scalar_lea.sflag (!%p1134_p9), [#allocation4], %s141_s15 }
  0x47   : > { %s1056_s27 = scalar_lea.vmem (!%p1134_p9), [#allocation3], %s683_s16  ;;  %p1135_p12 = scmp.ne.s32.totalorder (!%p1134_p9), %s1129_s19, 0 }
  0x4c   : > { %881 = dma.done.wait (%p1135_p12), %s142_s18, 2048  }
  0x4d   : > { %883 = vsyncadd (%p1135_p12), %s142_s18, 4294965248  ;;  %p1136_p2 = scmp.eq.s32.totalorder %s952_s13, 0 }
  0x4f   : > { %885 = dma.done.wait (%p1136_p2), [#allocation7], 256   ;;  %p1137_p8 = pmov %p1136_p2 }
  0x50   : > { %p1138_p3 = scmp.ne.s32.totalorder %s952_s13, 0 }
  0x51   : > { %887 = vsyncadd (%p1137_p8), [#allocation7], 4294967040  ;;  %vm170_vm0 = vcmask (!%p1138_p3), 130048   ;;  %v915_v0 = vmov (!%p1138_p3), 0.0  }
  0x52   : > { %169 = sbr.rel (%p1138_p3) target bundleno = 89 (0x59), region = 40  ;;  %171 = vst.msk [vmem:[#allocation2] sm:$0xff] (!%p1138_p3), %vm170_vm0, %v915_v0  ;;  %172 = vst.msk [vmem:[#allocation2 + $0x8] sm:$0xff] (!%p1138_p3), %vm170_vm0, %v915_v0 }
  0x59 PF: > { %v174_v1 = vld [vmem:[%s1056_s27 + $0x8] sm:$0xff]  ;;  %v173_v3 = vld [vmem:[%s1056_s27] sm:$0xff]  ;;  %v176_v6 = vld [vmem:[%s1056_s27 + $0x18] sm:$0xff]  ;;  %vm493_vm1 = vcmask 130048   ;;  %p686_p6 = scmp.ne.s32.totalorder %s952_s13, 1 }
  0x5a   : > { %v182_v2 = vld [vmem:[%s1056_s27 + $0x48] sm:$0xff]  ;;  %v181_v5 = vld [vmem:[%s1056_s27 + $0x40] sm:$0xff]  ;;  %v184_v7 = vld [vmem:[%s1056_s27 + $0x58] sm:$0xff]  ;;  %255 = vmatprep.mubr.f32.mxu0 %v174_v1  ;;  %330 = vmatprep.mubr.f32.mxu1 %v176_v6  ;;  %v502_v51 = vlaneseq (!%p686_p6)  ;;  %s916_s29 = smov (!%p686_p6), 0.0  }
  0x5b   : > { %v692_v4 = vpack.c.bf16 %v182_v2, %v174_v1  ;;  %v694_v8 = vpack.c.bf16 %v181_v5, %v173_v3  ;;  %v696_v9 = vpack.c.bf16 %v184_v7, %v176_v6  ;;  %v175_v10 = vld [vmem:[%s1056_s27 + $0x10] sm:$0xff]  ;;  %v178_v12 = vld [vmem:[%s1056_s27 + $0x28] sm:$0xff]  ;;  %v180_v16 = vld [vmem:[%s1056_s27 + $0x38] sm:$0xff] }
  0x5c   : > { %v183_v11 = vld [vmem:[%s1056_s27 + $0x50] sm:$0xff]  ;;  %v186_v14 = vld [vmem:[%s1056_s27 + $0x68] sm:$0xff]  ;;  %v188_v17 = vld [vmem:[%s1056_s27 + $0x78] sm:$0xff]  ;;  %v503_v53 = vshrl.u32 (!%p686_p6), %v502_v51, 7  ;;  %v506_v54 = vand.u32 (!%p686_p6), 127, %v502_v51 }
  0x5d   : > { %693 = vmatprep.subr.bf16.mxu0 %v692_v4  ;;  %v698_v13 = vpack.c.bf16 %v183_v11, %v175_v10  ;;  %697 = vmatprep.subr.bf16.mxu1 %v696_v9  ;;  %v700_v15 = vpack.c.bf16 %v186_v14, %v178_v12  ;;  %v177_v18 = vld [vmem:[%s1056_s27 + $0x20] sm:$0xff]  ;;  %v704_v20 = vpack.c.bf16 %v188_v17, %v180_v16  ;;  %v179_v21 = vld [vmem:[%s1056_s27 + $0x30] sm:$0xff]  ;;  %v190_v47 = vld [vmem:[#allocation2 + $0x8] sm:$0xff] }
  0x5e   : > { %695 = vmatpush1.bf16.xpose.msra.mxu0 %v694_v8  ;;  %v185_v19 = vld [vmem:[%s1056_s27 + $0x60] sm:$0xff]  ;;  %v187_v22 = vld [vmem:[%s1056_s27 + $0x70] sm:$0xff]  ;;  %vm507_vm2 = vcmp.eq.s32.totalorder (!%p686_p6), %v503_v53, %v506_v54  ;;  %v504_v56 = vadd.s32 (!%p686_p6), 8, %v503_v53 }
  0x5f   : > { %699 = vmatpush1.bf16.xpose.msra.mxu1 %v698_v13  ;;  %701 = vmatprep.subr.bf16.mxu0 %v700_v15  ;;  %v702_v23 = vpack.c.bf16 %v185_v19, %v177_v18  ;;  %v706_v24 = vpack.c.bf16 %v187_v22, %v179_v21  ;;  %v189_v39 = vld [vmem:[#allocation2] sm:$0xff] }
  0x60   : > { %705 = vmatprep.subr.bf16.mxu1 %v704_v20  ;;  %vm508_vm3 = vcmp.eq.s32.totalorder (!%p686_p6), %v504_v56, %v506_v54 }
  0x65   : > { %256 = vmatmul.mubr.f32.vlgmr.msra.gmra.mrb[0].mxu0 %v173_v3 }
  0x66   : > { %331 = vmatmul.mubr.f32.vlgmr.msra.gmra.mrb[0].mxu1 %v175_v10  ;;  %703 = vmatpush1.bf16.xpose.msra.mxu0 %v702_v23 }
  0x67   : > { %260 = vmatprep.mubr.f32.mxu0 %v182_v2  ;;  %707 = vmatpush1.bf16.xpose.msra.mxu1 %v706_v24 }
  0x68   : > { %335 = vmatprep.mubr.f32.mxu1 %v184_v7 }
  0x69   : > { %261 = vmatmul.mubr.f32.gmra.mrb[2].mxu0 %v181_v5 }
  0x6a   : > { %336 = vmatmul.mubr.f32.gmra.mrb[2].mxu1 %v183_v11  ;;  %405 = vmatprep.mubr.f32.mxu0 %v178_v12 }
  0x6b   : > { %480 = vmatprep.mubr.f32.mxu1 %v180_v16 }
  0x6d   : > { %406 = vmatmul.mubr.f32.vlgmr.msra.gmra.mrb[4].mxu0 %v177_v18 }
  0x6e   : > { %481 = vmatmul.mubr.f32.vlgmr.msra.gmra.mrb[4].mxu1 %v179_v21  ;;  %410 = vmatprep.mubr.f32.mxu0 %v186_v14 }
  0x6f   : > { %485 = vmatprep.mubr.f32.mxu1 %v188_v17 }
  0x71   : > { %411 = vmatmul.mubr.f32.gmra.mrb[6].mxu0 %v185_v19 }
  0x72   : > { %486 = vmatmul.mubr.f32.gmra.mrb[6].mxu1 %v187_v22 }
 0x138   : > { %v257_v25 = vpop.f32.mrb[0].mxu0 }
 0x139   : > { %v259_v26 = vpop.f32.mrb[1].mxu0  ;;  %v332_v27 = vpop.f32.mrb[0].mxu1 }
 0x13a   : > { %v333_v28 = vadd.f32 %v332_v27, %v257_v25  ;;  %v334_v29 = vpop.f32.mrb[1].mxu1  ;;  %v532_v27 = vld [vmem:[#allocation6] sm:$0xff] (!%p686_p6) }
 0x13c   : > { %v262_v30 = vpop.f32.mrb[2].mxu0 }
 0x13d   : > { %v264_v31 = vpop.f32.mrb[3].mxu0  ;;  %v337_v32 = vpop.f32.mrb[2].mxu1 }
 0x13e   : > { %v338_v33 = vadd.f32 %v337_v32, %v262_v30  ;;  %v339_v34 = vpop.f32.mrb[3].mxu1  ;;  %v533_v30 = vld [vmem:[#allocation6 + $0x8] sm:$0xff] (!%p686_p6) }
 0x140   : > { %v407_v35 = vpop.f32.mrb[4].mxu0 }
 0x141   : > { %v408_v36 = vadd.f32 %v407_v35, %v333_v28  ;;  %v409_v37 = vpop.f32.mrb[5].mxu0  ;;  %v482_v38 = vpop.f32.mrb[4].mxu1 }
 0x142   : > { %v484_v40 = vpop.f32.mrb[5].mxu1 }
 0x143   : > { %v483_v41 = vadd.f32 %v482_v38, %v408_v36 }
 0x144   : > { %v412_v42 = vpop.f32.mrb[6].mxu0 }
 0x145   : > { %v491_v43 = vadd.f32 %v483_v41, %v189_v39  ;;  %v413_v44 = vadd.f32 %v412_v42, %v338_v33  ;;  %v414_v45 = vpop.f32.mrb[7].mxu0  ;;  %v487_v46 = vpop.f32.mrb[6].mxu1  ;;  %499 = sbr.rel (%p686_p6) target bundleno = 790 (0x316), region = 44 }
 0x146   : > { %v489_v48 = vpop.f32.mrb[7].mxu1 }
 0x147   : > { %494 = vst.msk [vmem:[#allocation2] sm:$0xff] %vm493_vm1, %v491_v43  ;;  %v488_v49 = vadd.f32 %v487_v46, %v413_v44 }
 0x149   : > { %v492_v50 = vadd.f32 %v488_v49, %v190_v47 }
 0x14b   : > { %495 = vst.msk [vmem:[#allocation2 + $0x8] sm:$0xff] %vm493_vm1, %v492_v50 }
 0x14e   : > { %v500_v52 = vld [vmem:[#allocation2] sm:$0xff] }
 0x14f   : > { %v509_v57 = vsel %vm507_vm2, %v500_v52, 0.0  ;;  %v526_v4 = vmul.f32 2.0, %v500_v52 }
 0x150   : > { %v511_v58 = vsel %vm493_vm1, %v509_v57, 0.0 }
 0x151   : > { %512 = vadd.xlane.f32.xlu0 %v511_v58 }
 0x152   : > { %v501_v55 = vld [vmem:[#allocation2 + $0x8] sm:$0xff] }
 0x153   : > { %v510_v59 = vsel %vm508_vm3, %v501_v55, 0.0  ;;  %v527_v7 = vmul.f32 2.0, %v501_v55 }
 0x154   : > { %v514_v60 = vsel %vm493_vm1, %v510_v59, 0.0 }
 0x155   : > { %v517_v61 = vadd.f32 %v514_v60, %v511_v58  ;;  %515 = vadd.xlane.f32.xlu0 %v514_v60 }
 0x157   : > { %v518_v62 = vrot.slane %v517_v61, 4 }
 0x159   : > { %v519_v63 = vadd.f32 %v518_v62, %v517_v61 }
 0x15b   : > { %v520_v0 = vrot.slane %v519_v63, 2 }
 0x15d   : > { %v521_v1 = vadd.f32 %v520_v0, %v519_v63 }
 0x15f   : > { %v522_v2 = vrot.slane %v521_v1, 1 }
 0x161   : > { %v523_v3 = vadd.f32 %v522_v2, %v521_v1 }
 0x1de   : > { %v513_v5 = vpop.xlane.xlu0 %512 }
 0x1df   : > { %v524_v6 = vadd.f32 %v523_v3, %v513_v5 }
 0x1e1   : > { %v528_v8 = vsub.f32 %v524_v6, %v526_v4 }
 0x1e2   : > { %v516_v9 = vpop.xlane.xlu0 %515 }
 0x1e3   : > { %v530_v10 = vmax.f32 %v528_v8, 0.0  ;;  %v525_v11 = vadd.f32 %v523_v3, %v516_v9 }
 0x1e5   : > { %v534_v12 = vmul.f32 -0.5, %v530_v10  ;;  %v555_v13 = vmul.f32 -0.125, %v530_v10  ;;  %v576_v14 = vmul.f32 -0.005, %v530_v10  ;;  %v529_v15 = vsub.f32 %v525_v11, %v527_v7 }
 0x1e7   : > { %v536_v16 = vmul.f32 1.442695, %v534_v12  ;;  %v557_v17 = vmul.f32 1.442695, %v555_v13  ;;  %v578_v18 = vmul.f32 1.442695, %v576_v14 }
 0x1e8   : > { %v531_v19 = vmax.f32 %v529_v15, 0.0 }
 0x1e9   : > { %780 = vpow2.f32 %v536_v16 }
 0x1ea   : > { %v535_v20 = vmul.f32 -0.5, %v531_v19  ;;  %v556_v21 = vmul.f32 -0.125, %v531_v19  ;;  %v577_v22 = vmul.f32 -0.005, %v531_v19  ;;  %782 = vpow2.f32 %v557_v17 }
 0x1eb   : > { %784 = vpow2.f32 %v578_v18 }
 0x1ec   : > { %v538_v23 = vmul.f32 1.442695, %v535_v20  ;;  %v559_v24 = vmul.f32 1.442695, %v556_v21  ;;  %v580_v25 = vmul.f32 1.442695, %v577_v22 }
 0x1ee   : > { %786 = vpow2.f32 %v538_v23 }
 0x1ef   : > { %788 = vpow2.f32 %v559_v24 }
 0x1f0   : > { %790 = vpow2.f32 %v580_v25 }
 0x1f3   : > { %v781_v26 = vpop.eup %780 }
 0x1f4   : > { %v783_v28 = vpop.eup %782  ;;  %v540_v31 = vmul.f32 %v781_v26, %v532_v27 }
 0x1f5   : > { %v785_v29 = vpop.eup %784  ;;  %v561_v33 = vmul.f32 %v783_v28, %v532_v27 }
 0x1f6   : > { %v582_v35 = vmul.f32 %v785_v29, %v532_v27  ;;  %v542_v40 = vsel %vm493_vm1, %v540_v31, 0.0 }
 0x1f7   : > { %v563_v43 = vsel %vm493_vm1, %v561_v33, 0.0 }
 0x1f8   : > { %v787_v32 = vpop.eup %786  ;;  %v584_v45 = vsel %vm493_vm1, %v582_v35, 0.0 }
 0x1f9   : > { %v789_v34 = vpop.eup %788  ;;  %v541_v36 = vmul.f32 %v787_v32, %v533_v30 }
 0x1fa   : > { %v791_v37 = vpop.eup %790  ;;  %v562_v38 = vmul.f32 %v789_v34, %v533_v30 }
 0x1fb   : > { %v583_v39 = vmul.f32 %v791_v37, %v533_v30  ;;  %v543_v41 = vsel %vm493_vm1, %v541_v36, 0.0 }
 0x1fc   : > { %v544_v42 = vadd.f32 %v543_v41, %v542_v40  ;;  %v564_v44 = vsel %vm493_vm1, %v562_v38, 0.0 }
 0x1fd   : > { %v585_v46 = vsel %vm493_vm1, %v583_v39, 0.0  ;;  %v565_v47 = vadd.f32 %v564_v44, %v563_v43 }
 0x1fe   : > { %v586_v48 = vadd.f32 %v585_v46, %v584_v45  ;;  %545 = vadd.xlane.f32.xlu1 %v544_v42 }
 0x200   : > { %587 = vadd.xlane.f32.xlu0 %v586_v48 }
 0x202   : > { %566 = vadd.xlane.f32.xlu1 %v565_v47 }
 0x28b   : > { %v546_v49 = vpop.xlane.xlu1 %545 }
 0x28c   : > { %v547_v50 = vrot.slane %v546_v49, 4 }
 0x28d   : > { %v588_v51 = vpop.xlane.xlu0 %587 }
 0x28e   : > { %v589_v52 = vrot.slane %v588_v51, 4  ;;  %v548_v53 = vadd.f32 %v547_v50, %v546_v49 }
 0x28f   : > { %v567_v54 = vpop.xlane.xlu1 %566 }
 0x290   : > { %v590_v55 = vadd.f32 %v589_v52, %v588_v51  ;;  %v549_v56 = vrot.slane %v548_v53, 2  ;;  %v568_v57 = vrot.slane %v567_v54, 4 }
 0x292   : > { %v591_v58 = vrot.slane %v590_v55, 2  ;;  %v569_v59 = vadd.f32 %v568_v57, %v567_v54  ;;  %v550_v60 = vadd.f32 %v549_v56, %v548_v53 }
 0x294   : > { %v592_v61 = vadd.f32 %v591_v58, %v590_v55  ;;  %v570_v62 = vrot.slane %v569_v59, 2  ;;  %v551_v63 = vrot.slane %v550_v60, 1 }
 0x296   : > { %v571_v0 = vadd.f32 %v570_v62, %v569_v59  ;;  %v552_v1 = vadd.f32 %v551_v63, %v550_v60  ;;  %v593_v2 = vrot.slane %v592_v61, 1 }
 0x298   : > { %708 = vpush %v552_v1  ;;  %v572_v3 = vrot.slane %v571_v0, 1  ;;  %v594_v5 = vadd.f32 %v593_v2, %v592_v61 }
 0x29a   : > { %v573_v4 = vadd.f32 %v572_v3, %v571_v0 }
 0x29c   : > { %710 = vpush %v573_v4 }
 0x29d   : > { %712 = vpush %v594_v5 }
 0x2c9   : > { %s709_s19 = spop %708 }
 0x2cd   : > { %s711_s20 = spop %710 }
 0x2ce   : > { %s575_s26 = sadd.f32 %s711_s20, %s709_s19  ;;  %s713_s21 = spop %712 }
 0x2d0   : > { %s596_s28 = sadd.f32 %s713_s21, %s575_s26 }
 0x2d2   : > { %s597_s23 = smax.f32 %s916_s29, %s596_s28 }
 0x2d3   : > { %v598_v6 = vstv %s597_s23 }
 0x2d4   : > { %792 = vrsqrt.f32 %v598_v6  ;;  %vm601_vm4 = vcmp.eq.f32.partialorder %v598_v6, inf  ;;  %v604_v9 = vand.u32 2147483648, %v598_v6  ;;  %vm603_vm5 = vcmp.eq.f32.partialorder %v598_v6, 0.0 }
 0x2de   : > { %v793_v7 = vpop.eup %792 }
 0x2df   : > { %v600_v8 = vmul.f32 %v793_v7, %v598_v6 }
 0x2e1   : > { %v602_v10 = vsel %vm601_vm4, %v598_v6, %v600_v8 }
 0x2e2   : > { %v605_v11 = vsel %vm603_vm5, %v604_v9, %v602_v10 }
 0x2e3   : > { %714 = vpush %v605_v11 }
 0x314   : > { %s715_s22 = spop %714 }
 0x315   : > { %608 = sst [smem:[#allocation8]] %s715_s22 }
 0x316 PF: > { %p737_p7 = scmp.eq.s32.totalorder %s952_s13, 1  ;;  %s852_s3 = scalar_lea.hbm %s1123_s2, 16 }
 0x317   : > { %p853_p4 = scmp.ne.s32.totalorder %s1123_s2, %s852_s3  ;;  %p858_p5 = scmp.lt.u32.totalorder %s852_s3, %s1123_s2 }
 0x319   : > { %p854_p11 = pnand %p853_p4, %p737_p7 }
 0x31b   : > { %p855_p13 = pneg %p854_p11 }
 0x31d   : > { %p860_p10 = pnand %p858_p5, %p855_p13 }
 0x31f   : > { %863 = shalt.err (!%p860_p10)
}
 0x320   : > { %s917_s7 = smov [#allocation8]  }
 0x321   : > { %723 = dma.smem_to_hbm (%p737_p7), %s917_s7, 16, %s1123_s2, [#allocation5]  }
 0x322   : > { %889 = dma.done.wait (%p737_p7), [#allocation5], 16  }
 0x323   : > { %891 = vsyncadd (%p737_p7), [#allocation5], 4294967280 }
 0x324   : > { %622 = sfence }
 0x325 PF: > { %p14_p0 = scmp.ge.s32.totalorder %s955_s14, 4   ;;  %s1139_s9 = smov %s898_s10 }
 0x326   : > { %s1140_s10 = smov %s902_s11  ;;  %s1141_s11 = smov %s965_s17 }
 0x327   : > { %s1142_s12 = smov %s955_s14  ;;  %16 = sbr.rel (!%p14_p0) target bundleno = 5 (0x5), region = 78 }
 0x32e   :  { %628 = vsyncpa [#allocation4], 1 }
 0x32f   :  { %630 = vsyncpa [#allocation4 + $0x1], 1 }
 0x330   :  { %631 = vsyncpa [#allocation7], 1 }
 0x331   :  { %632 = vsyncpa [#allocation5], 1 }
 0x332   :  { %634 = vsyncpa [#allocation5 + $0x1], 1 }

</bundles_post_ra>
